<compile_context>
chip_gen: v7x
topology: tpu7x:2x2x1
jax: 0.10.0
libtpu: 0.0.40
codegen_flags: <defaults>
</compile_context>

<pallas_src>
import functools

import jax
import jax.numpy as jnp
import numpy as np
from jax import lax
from jax.experimental import pallas as pl
from jax.experimental.pallas import tpu as pltpu


# ---------------------------------------------------------------------------
# Kernel
# ---------------------------------------------------------------------------
def _normalize_kernel(x_ref, o_ref, *, power):
    """Normalize each row of the (tile_rows, D) block along the lane axis."""
    x = x_ref[...].astype(jnp.float32)
    if power == 2:
        # sum-of-squares (single pass) -> rsqrt on the EUP -> VPU multiply.
        ss = jnp.sum(x * x, axis=-1, keepdims=True)
        out = x * lax.rsqrt(ss)
    else:
        norm = jnp.sum(x ** power, axis=-1, keepdims=True) ** (1.0 / power)
        out = x * pl.reciprocal(norm)
    o_ref[...] = out.astype(o_ref.dtype)


# ---------------------------------------------------------------------------
# Wrapper
# ---------------------------------------------------------------------------
def normalize(x, power=2, *, block_rows=512):
    """Pallas equivalent of Normalize(power).forward(x) (normalizes dim=1)."""
    orig_shape = x.shape
    orig_dtype = x.dtype
    ndim = x.ndim

    if ndim == 2:
        x2 = x
    else:
        # Move the normalized axis (dim=1) to the lanes and flatten the rest.
        perm = (0,) + tuple(range(2, ndim)) + (1,)
        x2 = jnp.transpose(x, perm).reshape(-1, orig_shape[1])

    rows, d = x2.shape

    # Row-tile: multiple of 8 sublanes, capped by block_rows; pad rows so the
    # grid divides evenly (padded rows are discarded after the call).
    tr = min(block_rows, rows)
    tr = max(8, (tr // 8) * 8)
    padded_rows = pl.cdiv(rows, tr) * tr
    if padded_rows != rows:
        x2 = jnp.pad(x2, ((0, padded_rows - rows), (0, 0)))

    grid = (padded_rows // tr,)
    out = pl.pallas_call(
        functools.partial(_normalize_kernel, power=power),
        out_shape=jax.ShapeDtypeStruct((padded_rows, d), orig_dtype),
        grid=grid,
        in_specs=[pl.BlockSpec((tr, d), lambda i: (i, 0))],
        out_specs=pl.BlockSpec((tr, d), lambda i: (i, 0)),
        compiler_params=pltpu.CompilerParams(
            dimension_semantics=("parallel",)),
    )(x2)

    out = out[:rows]
    if ndim != 2:
        # Undo the flatten/transpose: rows -> (B, *spatial, C) -> (B, C, *spatial)
        out = out.reshape((orig_shape[0],) + orig_shape[2:] + (orig_shape[1],))
        inv_perm = (0, ndim - 1) + tuple(range(1, ndim - 1))
        out = jnp.transpose(out, inv_perm)
    return out


# ---------------------------------------------------------------------------
# Pure-JAX reference (mirrors the PyTorch module exactly)
# ---------------------------------------------------------------------------
def normalize_ref(x, power=2):
    norm = jnp.sum(x ** power, axis=1, keepdims=True) ** (1.0 / power)
    return x / norm


# ---------------------------------------------------------------------------
# Self-test
# ---------------------------------------------------------------------------
if __name__ == "__main__":
    key = jax.random.PRNGKey(0)
    k1, k2 = jax.random.split(key)

    # Typical use in the parent model: L2-normalize (batch, features) vectors.
    x_2d = jax.random.normal(k1, (8, 256), jnp.float32)
    # Also exercise the NCHW path (dim=1 = channels).
    x_4d = jax.random.normal(k2, (2, 4, 16, 16), jnp.float32)

    norm_fn = jax.jit(normalize)

    y_2d = norm_fn(x_2d)
    y_4d = norm_fn(x_4d)
    jax.block_until_ready((y_2d, y_4d))

    np.testing.assert_allclose(np.asarray(y_2d),
                               np.asarray(normalize_ref(x_2d)),
                               rtol=1e-5, atol=1e-6)
    np.testing.assert_allclose(np.asarray(y_4d),
                               np.asarray(normalize_ref(x_4d)),
                               rtol=1e-5, atol=1e-6)
    # Rows should now have unit L2 norm.
    np.testing.assert_allclose(np.linalg.norm(np.asarray(y_2d), axis=1),
                               np.ones(y_2d.shape[0]), rtol=1e-5, atol=1e-5)

    print("KERNEL_OK")
</pallas_src>

<mosaic_0001>
module attributes {stable_mosaic.version = 11 : i64} {
  func.func @_normalize_kernel(%arg0: i32, %arg1: memref<8x256xf32, #tpu.memory_space<vmem>>, %arg2: memref<8x256xf32, #tpu.memory_space<vmem>>) attributes {dimension_semantics = [#tpu.dimension_semantics<parallel>], iteration_bounds = array<i64: 1>, scalar_prefetch = 0 : i64, scratch_operands = 0 : i64, tpu.core_type = #tpu.core_type<tc>, window_params = [{transform_indices = @transform_0, window_bounds = array<i64: 8, 256>}, {transform_indices = @transform_1, window_bounds = array<i64: 8, 256>}]} {
    %c0 = arith.constant 0 : index
    %c0_0 = arith.constant 0 : index
    %0 = vector.load %arg1[%c0, %c0_0] : memref<8x256xf32, #tpu.memory_space<vmem>>, vector<8x256xf32>
    %1 = arith.mulf %0, %0 : vector<8x256xf32>
    %cst = arith.constant dense<0.000000e+00> : vector<8xf32>
    %2 = vector.multi_reduction <add>, %1, %cst [1] : vector<8x256xf32> to vector<8xf32>
    %3 = vector.shape_cast %2 : vector<8xf32> to vector<8x1xf32>
    %4 = math.rsqrt %3 : vector<8x1xf32>
    %5 = vector.broadcast %4 : vector<8x1xf32> to vector<8x256xf32>
    %6 = arith.mulf %0, %5 : vector<8x256xf32>
    %c0_1 = arith.constant 0 : index
    %c0_2 = arith.constant 0 : index
    %7 = vector.load %arg2[%c0_1, %c0_2] : memref<8x256xf32, #tpu.memory_space<vmem>>, vector<8x256xf32>
    tpu.vector_store %arg2[%c0_1, %c0_2], %6 {strides = array<i32>} : memref<8x256xf32, #tpu.memory_space<vmem>>, vector<8x256xf32>,
    return
  }
  func.func @transform_0(%arg0: i32) -> (i32, i32) {
    %c0_i32 = arith.constant 0 : i32
    %c0_i32_0 = arith.constant 0 : i32
    return %arg0, %c0_i32 : i32, i32
  }
  func.func @transform_1(%arg0: i32) -> (i32, i32) {
    %c0_i32 = arith.constant 0 : i32
    %c0_i32_0 = arith.constant 0 : i32
    return %arg0, %c0_i32 : i32, i32
  }
}

</mosaic_0001>

<bundles_post_ra>
// kernel: normalize.1
= control target key start
LH: loop header
LB: loop body
LE: loop exit
PB: predicated region body
PF: predicated region fallthrough
CT: control target
= control target key end

     0   :  { %6 = vsyncpa [#allocation3], 0  ;;  %s136_s0 = inlined_call_operand.hbm [shape: f32[8,256], index: 0, kind: input, shape index: {}]   ;;  %s137_s1 = inlined_call_operand.hbm [shape: f32[8,256], index: 1, kind: output, shape index: {}]  }
   0x1   :  { %7 = vsyncpa [#allocation4], 0  ;;  %s100_s6 = smov [#allocation2]   ;;  %s52_s10 = scalar_lea.hbm %s136_s0, 256 }
   0x2   :  { %s14_s7 = sshll.u32 %s100_s6, 4  ;;  %p53_p0 = scmp.ne.s32.totalorder %s136_s0, %s52_s10  ;;  %s15_s7 = int_to_ptr.vmem [resolvable:$true] %s14_s7 }
   0x3   :  { %p56_p1 = scmp.lt.u32.totalorder %s52_s10, %s136_s0 }
   0x5   :  { %p58_p2 = pnand %p56_p1, %p53_p0 }
   0x7   :  { %61 = shalt.err (!%p58_p2)
}
   0x8   :  { %s62_s15 = scalar_lea.vmem %s15_s7, 256  ;;  %p67_p4 = scmp.lt.s32.totalorder %s15_s7, %s15_s7 }
   0x9   :  { %p63_p3 = scmp.ne.s32.totalorder %s15_s7, %s62_s15  ;;  %p68_p5 = scmp.lt.s32.totalorder %s62_s15, %s62_s15 }
   0xb   :  { %p69_p6 = por %p68_p5, %p67_p4 }
   0xd   :  { %p70_p7 = pnand %p69_p6, %p63_p3 }
   0xf   :  { %73 = shalt.err (!%p70_p7)
}
  0x10   :  { %17 = dma.hbm_to_vmem [thread:$0]  %s136_s0, 256, %s15_s7, [#allocation3]  }
  0x11   :  { %96 = dma.done.wait [#allocation3], 256  }
  0x12   :  { %97 = vsyncadd [#allocation3], 4294967040  ;;  %v21_v0 = vld [vmem:[#allocation2] sm:$0xff]  ;;  %v22_v1 = vld [vmem:[#allocation2 + $0x8] sm:$0xff]  ;;  %s101_s18 = smov [#allocation5]  }
  0x13   :  { %v23_v2 = vmul.f32 %v21_v0, %v21_v0  ;;  %v24_v3 = vmul.f32 %v22_v1, %v22_v1  ;;  %s39_s19 = sshll.u32 %s101_s18, 4  ;;  %s40_s19 = int_to_ptr.vmem [resolvable:$true] %s39_s19 }
  0x14   :  { %s74_s20 = scalar_lea.vmem %s40_s19, 256  ;;  %p79_p9 = scmp.lt.s32.totalorder %s40_s19, %s40_s19 }
  0x15   :  { %v25_v4 = vadd.f32 %v24_v3, %v23_v2  ;;  %p75_p8 = scmp.ne.s32.totalorder %s40_s19, %s74_s20  ;;  %p80_p10 = scmp.lt.s32.totalorder %s74_s20, %s74_s20 }
  0x17   :  { %26 = vadd.xlane.f32.xlu0 %v25_v4  ;;  %p81_p11 = por %p80_p10, %p79_p9 }
  0x19   :  { %p82_p12 = pnand %p81_p11, %p75_p8 }
  0xa4   :  { %v27_v5 = vpop.xlane.xlu0 %26 }
  0xa5   :  { %50 = vrsqrt.f32 %v27_v5 }
  0xaf   :  { %v51_v6 = vpop.eup %50 }
  0xb0   :  { %v29_v7 = vmul.f32 %v51_v6, %v21_v0  ;;  %v30_v8 = vmul.f32 %v51_v6, %v22_v1 }
  0xb2   :  { %31 = vst [vmem:[#allocation5] sm:$0xff] %v29_v7  ;;  %32 = vst [vmem:[#allocation5 + $0x8] sm:$0xff] %v30_v8 }
  0xb3   :  { %85 = shalt.err (!%p82_p12)
}
  0xb4   :  { %s86_s22 = scalar_lea.hbm %s137_s1, 256 }
  0xb5   :  { %p87_p13 = scmp.ne.s32.totalorder %s137_s1, %s86_s22  ;;  %p90_p0 = scmp.lt.u32.totalorder %s86_s22, %s137_s1 }
  0xb7   :  { %p92_p1 = pnand %p90_p0, %p87_p13 }
  0xb9   :  { %95 = shalt.err (!%p92_p1)
}
  0xba   :  { %42 = dma.vmem_to_hbm [thread:$0]  %s40_s19, 256, %s137_s1, [#allocation4]  }
  0xbb   :  { %98 = dma.done.wait [#allocation4], 256  }
  0xbc   :  { %99 = vsyncadd [#allocation4], 4294967040 }
  0xbd   :  { %46 = vsyncpa [#allocation3], 1 }
  0xbe   :  { %47 = vsyncpa [#allocation4], 1 }

</bundles_post_ra>
